<compile_context>
chip_gen: v7x
topology: tpu7x:2x2x1
jax: 0.10.0
libtpu: 0.0.40
codegen_flags: <defaults>
</compile_context>

<pallas_src>
import math

import jax
import jax.numpy as jnp
from jax.experimental import pallas as pl
from jax.experimental.pallas import tpu as pltpu


def _gwl_kernel(x_ref, w_ref, b_ref, o_ref, acc_ref):
    # x_ref: (tB, C, tD), w_ref: (1, C, tD), b_ref: (1, C)
    # o_ref: (tB, C),     acc_ref: (tB, C) f32 scratch
    k = pl.program_id(1)

    @pl.when(k == 0)
    def _init():
        acc_ref[...] = jnp.zeros_like(acc_ref)

    x = x_ref[...].astype(jnp.float32)            # upcast: supports bf16 inputs
    w = w_ref[...].astype(jnp.float32)            # broadcasts over batch
    acc_ref[...] += jnp.sum(x * w, axis=-1)       # (tB, C), f32 accumulation

    @pl.when(k == pl.num_programs(1) - 1)
    def _finalize():
        o_ref[...] = (acc_ref[...] + b_ref[...].astype(jnp.float32)).astype(o_ref.dtype)


def _choose_block_d(D, C, itemsize, max_row_bytes=512 * 1024):
    """Largest reduction tile: full D if one (C, D) slab per row is modest,
    else the biggest multiple of 128 that divides D and fits the row budget."""
    if C * D * itemsize <= max_row_bytes:
        return D
    cand = (max_row_bytes // (C * itemsize)) // 128 * 128
    for td in range(cand, 0, -128):
        if D % td == 0:
            return td
    return D  # no clean 128-multiple divisor: fall back to a single reduction step


def _choose_block_b(B, C, tD, itemsize, target_tile_bytes=4 * 1024 * 1024):
    """Batch tile sized so one x tile ~ target_tile_bytes (double-buffered by Pallas)."""
    row_bytes = C * tD * itemsize
    tb = max(1, target_tile_bytes // row_bytes)
    if tb >= B:
        return B
    tb = (tb // 8) * 8          # keep (tB, C) output blocks sublane-aligned
    if tb < 8:
        tb = 8
    return min(tb, B)


def group_wise_linear(x, W, b, *, block_b=None, block_d=None):
    """x: (B, C, D), W: (1, C, D), b: (1, C) -> (B, C) in x.dtype."""
    B, C, D = x.shape
    itemsize = jnp.dtype(x.dtype).itemsize

    tD = block_d if block_d is not None else _choose_block_d(D, C, itemsize)
    tB = block_b if block_b is not None else _choose_block_b(B, C, tD, itemsize)
    if D % tD != 0:
        raise ValueError(f"block_d={tD} must divide hidden_dim={D} exactly")

    grid = (pl.cdiv(B, tB), D // tD)

    return pl.pallas_call(
        _gwl_kernel,
        out_shape=jax.ShapeDtypeStruct((B, C), x.dtype),
        grid_spec=pltpu.PrefetchScalarGridSpec(
            num_scalar_prefetch=0,
            grid=grid,
            in_specs=[
                pl.BlockSpec((tB, C, tD), lambda i, k: (i, 0, k)),   # x: streams per tile
                pl.BlockSpec((1, C, tD), lambda i, k: (0, 0, k)),    # W: resident over batch
                pl.BlockSpec((1, C), lambda i, k: (0, 0)),           # b: resident
            ],
            out_specs=pl.BlockSpec((tB, C), lambda i, k: (i, 0)),    # resident over k
            scratch_shapes=[pltpu.VMEM((tB, C), jnp.float32)],       # f32 accumulator
        ),
        compiler_params=pltpu.CompilerParams(
            # batch tiles are independent (megacore-shardable on v7x);
            # reduction axis is last and sequential.
            dimension_semantics=("parallel", "arbitrary"),
            # Tile budget is sized well under the 16/32 MiB scoped-VMEM defaults,
            # so no explicit vmem_limit_bytes is needed.
        ),
    )(x, W, b)


def init_params(key, num_class, hidden_dim):
    """Deterministic synthetic init mirroring reset_parameters()."""
    stdv = 1.0 / math.sqrt(hidden_dim)
    kw, kb = jax.random.split(key)
    W = jax.random.uniform(kw, (1, num_class, hidden_dim),
                           minval=-stdv, maxval=stdv, dtype=jnp.float32)
    b = jax.random.uniform(kb, (1, num_class),
                           minval=-stdv, maxval=stdv, dtype=jnp.float32)
    return W, b


if __name__ == "__main__":
    key = jax.random.PRNGKey(0)
    k_param, k_x, k_x2 = jax.random.split(key, 3)

    # --- small demo at module-like shapes (single grid step) ---
    batch, num_class, hidden_dim = 2, 8, 32
    W, b = init_params(k_param, num_class, hidden_dim)
    x = jax.random.normal(k_x, (batch, num_class, hidden_dim), dtype=jnp.float32)
    out = jax.block_until_ready(group_wise_linear(x, W, b))
    ref = jnp.sum(W * x, axis=-1) + b
    assert out.shape == (batch, num_class)
    assert jnp.allclose(out, ref, atol=1e-5, rtol=1e-5)

    # --- exercise the tiled / pipelined path (grid > 1 on both axes) ---
    B2, C2, D2 = 16, 8, 256
    W2, b2 = init_params(k_param, C2, D2)
    x2 = jax.random.normal(k_x2, (B2, C2, D2), dtype=jnp.float32)
    out2 = jax.block_until_ready(
        group_wise_linear(x2, W2, b2, block_b=8, block_d=128))
    ref2 = jnp.sum(W2 * x2, axis=-1) + b2
    assert jnp.allclose(out2, ref2, atol=1e-4, rtol=1e-4)

    # --- bf16 inputs (halves HBM traffic), f32 accumulation in-kernel ---
    out_bf16 = jax.block_until_ready(
        group_wise_linear(x2.astype(jnp.bfloat16), W2.astype(jnp.bfloat16),
                          b2.astype(jnp.bfloat16), block_b=8, block_d=128))
    assert jnp.allclose(out_bf16.astype(jnp.float32), ref2, atol=1e-1, rtol=1e-1)

    print("KERNEL_OK")
</pallas_src>

<mosaic_0001>
module attributes {stable_mosaic.version = 11 : i64} {
  func.func @_gwl_kernel(%arg0: i32, %arg1: i32, %arg2: memref<2x8x32xf32, #tpu.memory_space<vmem>>, %arg3: memref<1x8x32xf32, #tpu.memory_space<vmem>>, %arg4: memref<1x8xf32, #tpu.memory_space<vmem>>, %arg5: memref<2x8xf32, #tpu.memory_space<vmem>>, %arg6: memref<2x8xf32, #tpu.memory_space<vmem>>) attributes {dimension_semantics = [#tpu.dimension_semantics<parallel>, #tpu.dimension_semantics<arbitrary>], iteration_bounds = array<i64: 1, 1>, scalar_prefetch = 0 : i64, scratch_operands = 1 : i64, tpu.core_type = #tpu.core_type<tc>, window_params = [{transform_indices = @transform_0, window_bounds = array<i64: 2, 8, 32>}, {transform_indices = @transform_1, window_bounds = array<i64: 1, 8, 32>}, {pipeline_mode = #tpu.pipeline_mode<synchronous>, transform_indices = @transform_2, window_bounds = array<i64: 1, 8>}, {transform_indices = @transform_3, window_bounds = array<i64: 2, 8>}]} {
    %c0_i32 = arith.constant 0 : i32
    %0 = arith.cmpi eq, %arg1, %c0_i32 : i32
    %1 = arith.extui %0 : i1 to i32
    %c0_i32_0 = arith.constant 0 : i32
    %2 = arith.cmpi ne, %1, %c0_i32_0 : i32
    scf.if %2 {
      %cst_12 = arith.constant 0.000000e+00 : f32
      %14 = vector.broadcast %cst_12 : f32 to vector<2x8xf32>
      %c0_13 = arith.constant 0 : index
      %c0_14 = arith.constant 0 : index
      %15 = vector.load %arg6[%c0_13, %c0_14] : memref<2x8xf32, #tpu.memory_space<vmem>>, vector<2x8xf32>
      tpu.vector_store %arg6[%c0_13, %c0_14], %14 {strides = array<i32>} : memref<2x8xf32, #tpu.memory_space<vmem>>, vector<2x8xf32>,
    } else {
    }
    %c0 = arith.constant 0 : index
    %c0_1 = arith.constant 0 : index
    %c0_2 = arith.constant 0 : index
    %3 = vector.load %arg2[%c0, %c0_1, %c0_2] : memref<2x8x32xf32, #tpu.memory_space<vmem>>, vector<2x8x32xf32>
    %c0_3 = arith.constant 0 : index
    %c0_4 = arith.constant 0 : index
    %c0_5 = arith.constant 0 : index
    %4 = vector.load %arg3[%c0_3, %c0_4, %c0_5] : memref<1x8x32xf32, #tpu.memory_space<vmem>>, vector<1x8x32xf32>
    %c0_6 = arith.constant 0 : index
    %c0_7 = arith.constant 0 : index
    %5 = vector.load %arg6[%c0_6, %c0_7] : memref<2x8xf32, #tpu.memory_space<vmem>>, vector<2x8xf32>
    %6 = vector.broadcast %4 : vector<1x8x32xf32> to vector<2x8x32xf32>
    %7 = arith.mulf %3, %6 : vector<2x8x32xf32>
    %cst = arith.constant dense<0.000000e+00> : vector<2x8xf32>
    %8 = vector.multi_reduction <add>, %7, %cst [2] : vector<2x8x32xf32> to vector<2x8xf32>
    %9 = arith.addf %5, %8 : vector<2x8xf32>
    %c0_8 = arith.constant 0 : index
    %c0_9 = arith.constant 0 : index
    %10 = vector.load %arg6[%c0_8, %c0_9] : memref<2x8xf32, #tpu.memory_space<vmem>>, vector<2x8xf32>
    tpu.vector_store %arg6[%c0_8, %c0_9], %9 {strides = array<i32>} : memref<2x8xf32, #tpu.memory_space<vmem>>, vector<2x8xf32>,
    %c0_i32_10 = arith.constant 0 : i32
    %11 = arith.cmpi eq, %arg1, %c0_i32_10 : i32
    %12 = arith.extui %11 : i1 to i32
    %c0_i32_11 = arith.constant 0 : i32
    %13 = arith.cmpi ne, %12, %c0_i32_11 : i32
    scf.if %13 {
      %c0_12 = arith.constant 0 : index
      %c0_13 = arith.constant 0 : index
      %14 = vector.load %arg6[%c0_12, %c0_13] : memref<2x8xf32, #tpu.memory_space<vmem>>, vector<2x8xf32>
      %c0_14 = arith.constant 0 : index
      %c0_15 = arith.constant 0 : index
      %15 = vector.load %arg4[%c0_14, %c0_15] : memref<1x8xf32, #tpu.memory_space<vmem>>, vector<1x8xf32>
      %16 = vector.broadcast %15 : vector<1x8xf32> to vector<2x8xf32>
      %17 = arith.addf %14, %16 : vector<2x8xf32>
      %c0_16 = arith.constant 0 : index
      %c0_17 = arith.constant 0 : index
      %18 = vector.load %arg5[%c0_16, %c0_17] : memref<2x8xf32, #tpu.memory_space<vmem>>, vector<2x8xf32>
      tpu.vector_store %arg5[%c0_16, %c0_17], %17 {strides = array<i32>} : memref<2x8xf32, #tpu.memory_space<vmem>>, vector<2x8xf32>,
    } else {
    }
    return
  }
  func.func @transform_0(%arg0: i32, %arg1: i32) -> (i32, i32, i32) {
    %c0_i32 = arith.constant 0 : i32
    %c0_i32_0 = arith.constant 0 : i32
    return %arg0, %c0_i32, %arg1 : i32, i32, i32
  }
  func.func @transform_1(%arg0: i32, %arg1: i32) -> (i32, i32, i32) {
    %c0_i32 = arith.constant 0 : i32
    %c0_i32_0 = arith.constant 0 : i32
    %c0_i32_1 = arith.constant 0 : i32
    return %c0_i32, %c0_i32_0, %arg1 : i32, i32, i32
  }
  func.func @transform_2(%arg0: i32, %arg1: i32) -> (i32, i32) {
    %c0_i32 = arith.constant 0 : i32
    %c0_i32_0 = arith.constant 0 : i32
    %c0_i32_1 = arith.constant 0 : i32
    return %c0_i32, %c0_i32_0 : i32, i32
  }
  func.func @transform_3(%arg0: i32, %arg1: i32) -> (i32, i32) {
    %c0_i32 = arith.constant 0 : i32
    %c0_i32_0 = arith.constant 0 : i32
    return %arg0, %c0_i32 : i32, i32
  }
}

</mosaic_0001>

<bundles_post_ra>
// kernel: tpu_custom_call.1
= control target key start
LH: loop header
LB: loop body
LE: loop exit
PB: predicated region body
PF: predicated region fallthrough
CT: control target
= control target key end

     0   :  { %8 = vsyncpa [#allocation4], 0  ;;  %s254_s0 = inlined_call_operand.hbm [shape: f32[2,8,32], index: 0, kind: input, shape index: {}]   ;;  %s255_s1 = inlined_call_operand.hbm [shape: f32[1,8,32], index: 1, kind: input, shape index: {}]   ;;  %s256_s2 = inlined_call_operand.vmem [shape: f32[1,8], index: 2, kind: input, shape index: {}]   ;;  %s257_s3 = inlined_call_operand.hbm [shape: f32[2,8], index: 3, kind: output, shape index: {}]  }
   0x1   :  { %9 = vsyncpa [#allocation7], 0 }
   0x2   :  { %10 = vsyncpa [#allocation5], 0  ;;  %s186_s12 = smov [#allocation3]   ;;  %s114_s16 = scalar_lea.hbm %s254_s0, 256 }
   0x3   :  { %s16_s13 = sshll.u32 %s186_s12, 4  ;;  %p115_p0 = scmp.ne.s32.totalorder %s254_s0, %s114_s16  ;;  %s17_s13 = int_to_ptr.vmem [resolvable:$true] %s16_s13 }
   0x4   :  { %p118_p1 = scmp.lt.u32.totalorder %s114_s16, %s254_s0 }
   0x6   :  { %p120_p2 = pnand %p118_p1, %p115_p0 }
   0x8   :  { %123 = shalt.err (!%p120_p2)
}
   0x9   :  { %s124_s21 = scalar_lea.vmem %s17_s13, 256  ;;  %p129_p4 = scmp.lt.s32.totalorder %s17_s13, %s17_s13 }
   0xa   :  { %p125_p3 = scmp.ne.s32.totalorder %s17_s13, %s124_s21  ;;  %p130_p5 = scmp.lt.s32.totalorder %s124_s21, %s124_s21 }
   0xc   :  { %p131_p6 = por %p130_p5, %p129_p4 }
   0xe   :  { %p132_p7 = pnand %p131_p6, %p125_p3 }
  0x10   :  { %135 = shalt.err (!%p132_p7)
}
  0x11   :  { %s187_s22 = smov 128   ;;  %s188_s23 = smov 8  }
  0x12   :  { %22 = dma.hbm_to_vmem [thread:$0]  %s254_s0, 256, %s17_s13, [#allocation4], %s187_s22, %s187_s22, %s188_s23  }
  0x13   :  { %s189_s26 = smov [#allocation6]   ;;  %s136_s30 = scalar_lea.hbm %s255_s1, 128 }
  0x14   :  { %s29_s27 = sshll.u32 %s189_s26, 4  ;;  %p137_p8 = scmp.ne.s32.totalorder %s255_s1, %s136_s30  ;;  %s30_s27 = int_to_ptr.vmem [resolvable:$true] %s29_s27 }
  0x15   :  { %p140_p9 = scmp.lt.u32.totalorder %s136_s30, %s255_s1 }
  0x17   :  { %p142_p10 = pnand %p140_p9, %p137_p8 }
  0x19   :  { %145 = shalt.err (!%p142_p10)
}
  0x1a   :  { %s146_s8 = scalar_lea.vmem %s30_s27, 128  ;;  %p151_p12 = scmp.lt.s32.totalorder %s30_s27, %s30_s27 }
  0x1b   :  { %p147_p11 = scmp.ne.s32.totalorder %s30_s27, %s146_s8  ;;  %p152_p13 = scmp.lt.s32.totalorder %s146_s8, %s146_s8 }
  0x1d   :  { %p153_p0 = por %p152_p13, %p151_p12 }
  0x1f   :  { %p154_p1 = pnand %p153_p0, %p147_p11 }
  0x21   :  { %157 = shalt.err (!%p154_p1)
}
  0x22   :  { %32 = dma.hbm_to_vmem [thread:$0]  %s255_s1, 128, %s30_s27, [#allocation7]  }
  0x23   :  { %180 = dma.done.wait [#allocation4], 256  }
  0x24   :  { %181 = vsyncadd [#allocation4], 4294967040 }
  0x25   :  { %182 = dma.done.wait [#allocation7], 128  }
  0x26   :  { %183 = vsyncadd [#allocation7], 4294967168  ;;  %v47_v0 = vld [vmem:[#allocation3] sm:$0xff]  ;;  %v49_v1 = vld [vmem:[#allocation6] sm:$0xff]  ;;  %vm53_vm0 = vcmask 261120   ;;  %vm45_vm1 = vcmask 58368   ;;  %v62_v8 = vlaneseq }
  0x27   :  { %v48_v2 = vld [vmem:[#allocation3 + $0x8] sm:$0xff]  ;;  %v51_v3 = vmul.f32 %v49_v1, %v47_v0  ;;  %v190_v7 = vmov 0.0   ;;  %vm72_vm2 = vcmask 1041409   ;;  %v107_v19 = vld [vmem:[%s256_s2] ss:$0 sm:$0xff]  ;;  %s191_s11 = smov [#allocation8]  }
  0x28   :  { %v52_v4 = vmul.f32 %v49_v1, %v48_v2  ;;  %46 = vst.msk [vmem:[#allocation2] sm:$0x3] %vm45_vm1, %v190_v7  ;;  %v63_v9 = vand.u32 127, %v62_v8  ;;  %v65_v10 = vshrl.u32 %v62_v8, 7  ;;  %s97_s12 = sshll.u32 %s191_s11, 4  ;;  %s98_s12 = int_to_ptr.vmem [resolvable:$true] %s97_s12 }
  0x29   :  { %v54_v5 = vsel %vm53_vm0, %v51_v3, 0.0  ;;  %s158_s13 = scalar_lea.vmem %s98_s12, 32  ;;  %p163_p3 = scmp.lt.s32.totalorder %s98_s12, %s98_s12 }
  0x2a   :  { %55 = vadd.xlane.f32.xlu0 %v54_v5  ;;  %v57_v6 = vsel %vm53_vm0, %v52_v4, 0.0  ;;  %v66_v12 = vsub.s32 %v63_v9, %v65_v10  ;;  %p159_p2 = scmp.ne.s32.totalorder %s98_s12, %s158_s13  ;;  %p164_p4 = scmp.lt.s32.totalorder %s158_s13, %s158_s13 }
  0x2c   :  { %p165_p5 = por %p164_p4, %p163_p3 }
  0x2e   :  { %58 = vadd.xlane.f32.xlu0 %v57_v6  ;;  %p166_p6 = pnand %p165_p5, %p159_p2 }
  0x2f   :  { %v50_v16 = vld [vmem:[#allocation2] sm:$0x3] }
  0xb7   :  { %v56_v11 = vpop.xlane.xlu0 %55 }
  0xb8   :  { %v67_v14 = vrot.slane %v56_v11, %v66_v12 }
  0xbb   :  { %v59_v13 = vpop.xlane.xlu0 %58 }
  0xbc   :  { %v71_v15 = vrot.slane %v59_v13, %v66_v12 }
  0xbe   :  { %v73_v17 = vsel %vm72_vm2, %v71_v15, %v67_v14 }
  0xbf   :  { %v75_v18 = vadd.f32 %v73_v17, %v50_v16 }
  0xc1   :  { %77 = vst.msk [vmem:[#allocation2] sm:$0x3] %vm45_vm1, %v75_v18 }
  0xc8   :  { %v81_v20 = vld [vmem:[#allocation2] sm:$0x3] }
  0xc9   :  { %v89_v21 = vadd.f32 %v107_v19, %v81_v20 }
  0xcb   :  { %90 = vst.msk [vmem:[#allocation8] sm:$0x3] %vm45_vm1, %v89_v21 }
  0xcc   :  { %169 = shalt.err (!%p166_p6)
}
  0xcd   :  { %s170_s16 = scalar_lea.hbm %s257_s3, 32 }
  0xce   :  { %p171_p7 = scmp.ne.s32.totalorder %s257_s3, %s170_s16  ;;  %p174_p8 = scmp.lt.u32.totalorder %s170_s16, %s257_s3 }
  0xd0   :  { %p176_p9 = pnand %p174_p8, %p171_p7 }
  0xd2   :  { %179 = shalt.err (!%p176_p9)
}
  0xd3   :  { %100 = dma.vmem_to_hbm [thread:$0]  %s98_s12, 32, %s257_s3, [#allocation5]  }
  0xd4   :  { %184 = dma.done.wait [#allocation5], 32  }
  0xd5   :  { %185 = vsyncadd [#allocation5], 4294967264 }
  0xd6   :  { %104 = vsyncpa [#allocation4], 1 }
  0xd7   :  { %105 = vsyncpa [#allocation7], 1 }
  0xd8   :  { %106 = vsyncpa [#allocation5], 1 }

</bundles_post_ra>
